<compile_context>
chip_gen: v7x
topology: tpu7x:2x2x1
jax: 0.10.0
libtpu: 0.0.40
codegen_flags: <defaults>
</compile_context>

<pallas_src>
import jax
import jax.numpy as jnp
from jax.experimental import pallas as pl
from jax.experimental.pallas import tpu as pltpu


def xornet_kernel(xT_ref, w1_ref, b1_ref, w2_ref, b2_ref, o_ref):
    # xT_ref: [8, TB] VMEM  (rows 0,1 hold the two input features, batch on lanes)
    # w1_ref: [2*H] SMEM    (row-major flatten of [2, H]:  w1[i, j] -> w1_ref[i*H + j])
    # b1_ref: [H]   SMEM
    # w2_ref: [H]   SMEM
    # b2_ref: [1]   SMEM
    # o_ref:  [1, TB] VMEM  (lane-dense output: y for each batch element)
    H = b1_ref.shape[0]
    x0 = xT_ref[0:1, :]          # [1, TB]  feature 0
    x1 = xT_ref[1:2, :]          # [1, TB]  feature 1

    acc = jnp.zeros_like(x0) + b2_ref[0]
    # Fully unrolled over the (tiny, static) hidden size: pure VPU + EUP work.
    for j in range(H):
        pre = x0 * w1_ref[j] + x1 * w1_ref[H + j] + b1_ref[j]
        acc = acc + jnp.tanh(pre) * w2_ref[j]

    o_ref[...] = acc.astype(o_ref.dtype)


def xornet_forward(x, w1, b1, w2, b2, *, tb_max=2048):
    """x: [B, 2] f32; w1: [2, H]; b1: [H]; w2: [H]; b2: [1]  ->  [B, 1] f32."""
    assert tb_max % 128 == 0
    B = x.shape[0]
    H = w1.shape[1]

    # Lane-pad batch to a multiple of 128 (and of the batch tile).
    B_pad = -(-B // 128) * 128
    tb = min(B_pad, tb_max)
    B_pad = -(-B_pad // tb) * tb
    num_blocks = B_pad // tb

    # Transposed, padded activation slab: [8, B_pad], features on sublanes 0..1.
    xT = jnp.zeros((8, B_pad), jnp.float32).at[:2, :B].set(x.T.astype(jnp.float32))

    # Flat f32 parameter arrays for SMEM.
    w1_flat = w1.reshape(-1).astype(jnp.float32)      # (2*H,)
    b1_flat = b1.reshape(-1).astype(jnp.float32)      # (H,)
    w2_flat = w2.reshape(-1).astype(jnp.float32)      # (H,)
    b2_flat = b2.reshape(-1).astype(jnp.float32)      # (1,)

    smem = pl.BlockSpec(memory_space=pltpu.MemorySpace.SMEM)
    out_shape = jax.ShapeDtypeStruct((1, B_pad), jnp.float32)

    if num_blocks == 1:
        # Single block: no grid, no per-step pipeline overhead.
        call = pl.pallas_call(
            xornet_kernel,
            out_shape=out_shape,
            in_specs=[
                pl.BlockSpec((8, B_pad), lambda: (0, 0)),
                smem, smem, smem, smem,
            ],
            out_specs=pl.BlockSpec((1, B_pad), lambda: (0, 0)),
        )
    else:
        # Grid over batch lanes only; weights stay resident (whole-array SMEM).
        call = pl.pallas_call(
            xornet_kernel,
            out_shape=out_shape,
            grid=(num_blocks,),
            in_specs=[
                pl.BlockSpec((8, tb), lambda i: (0, i)),
                smem, smem, smem, smem,
            ],
            out_specs=pl.BlockSpec((1, tb), lambda i: (0, i)),
            compiler_params=pltpu.CompilerParams(
                dimension_semantics=("parallel",)
            ),
        )

    out = call(xT, w1_flat, b1_flat, w2_flat, b2_flat)   # [1, B_pad]
    return out[0, :B].reshape(B, 1)


def init_params(key, hidden_size=4):
    # Deterministic init mimicking nn.Linear: U(-1/sqrt(fan_in), 1/sqrt(fan_in)).
    k1, k2, k3, k4 = jax.random.split(key, 4)
    bound1 = 1.0 / jnp.sqrt(2.0)
    bound2 = 1.0 / jnp.sqrt(float(hidden_size))
    w1 = jax.random.uniform(k1, (2, hidden_size), jnp.float32, -bound1, bound1)
    b1 = jax.random.uniform(k2, (hidden_size,), jnp.float32, -bound1, bound1)
    w2 = jax.random.uniform(k3, (hidden_size,), jnp.float32, -bound2, bound2)
    b2 = jax.random.uniform(k4, (1,), jnp.float32, -bound2, bound2)
    return w1, b1, w2, b2


def _reference(x, w1, b1, w2, b2):
    return jnp.tanh(x @ w1 + b1) @ w2[:, None] + b2


if __name__ == "__main__":
    key = jax.random.PRNGKey(0)
    k_x, k_x2, k_p = jax.random.split(key, 3)

    hidden_size = 4
    w1, b1, w2, b2 = init_params(k_p, hidden_size)

    # Small batch: single-block (no grid) path.
    batch = 8
    x = jax.random.uniform(k_x, (batch, 2), jnp.float32)
    out = jax.block_until_ready(xornet_forward(x, w1, b1, w2, b2))
    ref = _reference(x, w1, b1, w2, b2)
    assert out.shape == (batch, 1)
    assert jnp.allclose(out, ref, atol=1e-5, rtol=1e-5)

    # Larger batch with a small tile to exercise the gridded "parallel" path.
    batch2 = 512
    x2 = jax.random.uniform(k_x2, (batch2, 2), jnp.float32)
    out2 = jax.block_until_ready(xornet_forward(x2, w1, b1, w2, b2, tb_max=128))
    ref2 = _reference(x2, w1, b1, w2, b2)
    assert out2.shape == (batch2, 1)
    assert jnp.allclose(out2, ref2, atol=1e-5, rtol=1e-5)

    print("KERNEL_OK")
</pallas_src>

<mosaic_0001>
module attributes {stable_mosaic.version = 11 : i64} {
  func.func @xornet_kernel(%arg0: memref<8x128xf32, #tpu.memory_space<vmem>>, %arg1: memref<8xf32, #tpu.memory_space<smem>>, %arg2: memref<4xf32, #tpu.memory_space<smem>>, %arg3: memref<4xf32, #tpu.memory_space<smem>>, %arg4: memref<1xf32, #tpu.memory_space<smem>>, %arg5: memref<1x128xf32, #tpu.memory_space<vmem>>) attributes {dimension_semantics = [], scalar_prefetch = 0 : i64, scratch_operands = 0 : i64, tpu.core_type = #tpu.core_type<tc>} {
    %c0 = arith.constant 0 : index
    %c0_0 = arith.constant 0 : index
    %0 = vector.load %arg0[%c0, %c0_0] : memref<8x128xf32, #tpu.memory_space<vmem>>, vector<1x128xf32>
    %c1 = arith.constant 1 : index
    %c0_1 = arith.constant 0 : index
    %1 = vector.load %arg0[%c1, %c0_1] : memref<8x128xf32, #tpu.memory_space<vmem>>, vector<1x128xf32>
    %cst = arith.constant 0.000000e+00 : f32
    %2 = vector.broadcast %cst : f32 to vector<1x128xf32>
    %c0_2 = arith.constant 0 : index
    %3 = memref.load %arg4[%c0_2] : memref<1xf32, #tpu.memory_space<smem>>
    %4 = vector.broadcast %3 : f32 to vector<1x128xf32>
    %5 = arith.addf %2, %4 : vector<1x128xf32>
    %c0_3 = arith.constant 0 : index
    %6 = memref.load %arg1[%c0_3] : memref<8xf32, #tpu.memory_space<smem>>
    %7 = vector.broadcast %6 : f32 to vector<1x128xf32>
    %8 = arith.mulf %0, %7 : vector<1x128xf32>
    %c4 = arith.constant 4 : index
    %9 = memref.load %arg1[%c4] : memref<8xf32, #tpu.memory_space<smem>>
    %10 = vector.broadcast %9 : f32 to vector<1x128xf32>
    %11 = arith.mulf %1, %10 : vector<1x128xf32>
    %12 = arith.addf %8, %11 : vector<1x128xf32>
    %c0_4 = arith.constant 0 : index
    %13 = memref.load %arg2[%c0_4] : memref<4xf32, #tpu.memory_space<smem>>
    %14 = vector.broadcast %13 : f32 to vector<1x128xf32>
    %15 = arith.addf %12, %14 : vector<1x128xf32>
    %16 = math.tanh %15 : vector<1x128xf32>
    %c0_5 = arith.constant 0 : index
    %17 = memref.load %arg3[%c0_5] : memref<4xf32, #tpu.memory_space<smem>>
    %18 = vector.broadcast %17 : f32 to vector<1x128xf32>
    %19 = arith.mulf %16, %18 : vector<1x128xf32>
    %20 = arith.addf %5, %19 : vector<1x128xf32>
    %c1_6 = arith.constant 1 : index
    %21 = memref.load %arg1[%c1_6] : memref<8xf32, #tpu.memory_space<smem>>
    %22 = vector.broadcast %21 : f32 to vector<1x128xf32>
    %23 = arith.mulf %0, %22 : vector<1x128xf32>
    %c5 = arith.constant 5 : index
    %24 = memref.load %arg1[%c5] : memref<8xf32, #tpu.memory_space<smem>>
    %25 = vector.broadcast %24 : f32 to vector<1x128xf32>
    %26 = arith.mulf %1, %25 : vector<1x128xf32>
    %27 = arith.addf %23, %26 : vector<1x128xf32>
    %c1_7 = arith.constant 1 : index
    %28 = memref.load %arg2[%c1_7] : memref<4xf32, #tpu.memory_space<smem>>
    %29 = vector.broadcast %28 : f32 to vector<1x128xf32>
    %30 = arith.addf %27, %29 : vector<1x128xf32>
    %31 = math.tanh %30 : vector<1x128xf32>
    %c1_8 = arith.constant 1 : index
    %32 = memref.load %arg3[%c1_8] : memref<4xf32, #tpu.memory_space<smem>>
    %33 = vector.broadcast %32 : f32 to vector<1x128xf32>
    %34 = arith.mulf %31, %33 : vector<1x128xf32>
    %35 = arith.addf %20, %34 : vector<1x128xf32>
    %c2 = arith.constant 2 : index
    %36 = memref.load %arg1[%c2] : memref<8xf32, #tpu.memory_space<smem>>
    %37 = vector.broadcast %36 : f32 to vector<1x128xf32>
    %38 = arith.mulf %0, %37 : vector<1x128xf32>
    %c6 = arith.constant 6 : index
    %39 = memref.load %arg1[%c6] : memref<8xf32, #tpu.memory_space<smem>>
    %40 = vector.broadcast %39 : f32 to vector<1x128xf32>
    %41 = arith.mulf %1, %40 : vector<1x128xf32>
    %42 = arith.addf %38, %41 : vector<1x128xf32>
    %c2_9 = arith.constant 2 : index
    %43 = memref.load %arg2[%c2_9] : memref<4xf32, #tpu.memory_space<smem>>
    %44 = vector.broadcast %43 : f32 to vector<1x128xf32>
    %45 = arith.addf %42, %44 : vector<1x128xf32>
    %46 = math.tanh %45 : vector<1x128xf32>
    %c2_10 = arith.constant 2 : index
    %47 = memref.load %arg3[%c2_10] : memref<4xf32, #tpu.memory_space<smem>>
    %48 = vector.broadcast %47 : f32 to vector<1x128xf32>
    %49 = arith.mulf %46, %48 : vector<1x128xf32>
    %50 = arith.addf %35, %49 : vector<1x128xf32>
    %c3 = arith.constant 3 : index
    %51 = memref.load %arg1[%c3] : memref<8xf32, #tpu.memory_space<smem>>
    %52 = vector.broadcast %51 : f32 to vector<1x128xf32>
    %53 = arith.mulf %0, %52 : vector<1x128xf32>
    %c7 = arith.constant 7 : index
    %54 = memref.load %arg1[%c7] : memref<8xf32, #tpu.memory_space<smem>>
    %55 = vector.broadcast %54 : f32 to vector<1x128xf32>
    %56 = arith.mulf %1, %55 : vector<1x128xf32>
    %57 = arith.addf %53, %56 : vector<1x128xf32>
    %c3_11 = arith.constant 3 : index
    %58 = memref.load %arg2[%c3_11] : memref<4xf32, #tpu.memory_space<smem>>
    %59 = vector.broadcast %58 : f32 to vector<1x128xf32>
    %60 = arith.addf %57, %59 : vector<1x128xf32>
    %61 = math.tanh %60 : vector<1x128xf32>
    %c3_12 = arith.constant 3 : index
    %62 = memref.load %arg3[%c3_12] : memref<4xf32, #tpu.memory_space<smem>>
    %63 = vector.broadcast %62 : f32 to vector<1x128xf32>
    %64 = arith.mulf %61, %63 : vector<1x128xf32>
    %65 = arith.addf %50, %64 : vector<1x128xf32>
    %c0_13 = arith.constant 0 : index
    %c0_14 = arith.constant 0 : index
    %66 = vector.load %arg5[%c0_13, %c0_14] : memref<1x128xf32, #tpu.memory_space<vmem>>, vector<1x128xf32>
    tpu.vector_store %arg5[%c0_13, %c0_14], %65 {strides = array<i32>} : memref<1x128xf32, #tpu.memory_space<vmem>>, vector<1x128xf32>,
    return
  }
}

</mosaic_0001>

<bundles_post_ra>
// kernel: tpu_custom_call.1
= control target key start
LH: loop header
LB: loop body
LE: loop exit
PB: predicated region body
PF: predicated region fallthrough
CT: control target
= control target key end

     0   :  { %11 = vsyncpa [#allocation4], 0  ;;  %s344_s0 = inlined_call_operand.hbm [shape: f32[8,128], index: 0, kind: input, shape index: {}]   ;;  %s345_s1 = inlined_call_operand.vmem [shape: f32[8], index: 1, kind: input, shape index: {}]   ;;  %s346_s2 = inlined_call_operand.vmem [shape: f32[4], index: 2, kind: input, shape index: {}]   ;;  %s347_s3 = inlined_call_operand.vmem [shape: f32[4], index: 3, kind: input, shape index: {}]   ;;  %s348_s4 = inlined_call_operand.<no memory space> [shape: f32[1], index: 4, kind: input, shape index: {}]   ;;  %s349_s5 = inlined_call_operand.hbm [shape: f32[1,128], index: 5, kind: output, shape index: {}]  }
   0x1   :  { %12 = vsyncpa [#allocation6], 0 }
   0x2   :  { %13 = vsyncpa [#allocation9], 0  ;;  %s41_s20 = sshll.u32 %s346_s2, 4  ;;  %s42_s20 = int_to_ptr.vmem [resolvable:$true] %s41_s20 }
   0x3   :  { %14 = vsyncpa [#allocation5], 0  ;;  %s179_s21 = scalar_lea.vmem %s42_s20, 16  ;;  %p184_p1 = scmp.lt.s32.totalorder %s42_s20, %s42_s20 }
   0x4   :  { %p180_p0 = scmp.ne.s32.totalorder %s42_s20, %s179_s21  ;;  %p185_p2 = scmp.lt.s32.totalorder %s179_s21, %s179_s21 }
   0x6   :  { %p186_p3 = por %p185_p2, %p184_p1 }
   0x8   :  { %p187_p4 = pnand %p186_p3, %p180_p0 }
   0xa   :  { %190 = shalt.err (!%p187_p4)
}
   0xb   :  { %s267_s22 = smov [#allocation8]   ;;  %s268_s23 = smov [#allocation3]  }
   0xc   :  { %44 = dma.vmem_to_smem %s42_s20, 16, %s267_s22, [#allocation9]  }
   0xd   :  { %s21_s24 = sshll.u32 %s268_s23, 4  ;;  %s31_s27 = sshll.u32 %s345_s1, 4  ;;  %s22_s24 = int_to_ptr.vmem [resolvable:$true] %s21_s24  ;;  %s32_s27 = int_to_ptr.vmem [resolvable:$true] %s31_s27 }
   0xe   :  { %s191_s29 = scalar_lea.hbm %s344_s0, 128 }
   0xf   :  { %p192_p5 = scmp.ne.s32.totalorder %s344_s0, %s191_s29  ;;  %p195_p6 = scmp.lt.u32.totalorder %s191_s29, %s344_s0 }
  0x11   :  { %p197_p7 = pnand %p195_p6, %p192_p5 }
  0x13   :  { %200 = shalt.err (!%p197_p7)
}
  0x14   :  { %s201_s9 = scalar_lea.vmem %s22_s24, 128  ;;  %p206_p9 = scmp.lt.s32.totalorder %s22_s24, %s22_s24 }
  0x15   :  { %p202_p8 = scmp.ne.s32.totalorder %s22_s24, %s201_s9  ;;  %p207_p10 = scmp.lt.s32.totalorder %s201_s9, %s201_s9 }
  0x17   :  { %p208_p11 = por %p207_p10, %p206_p9 }
  0x19   :  { %p209_p12 = pnand %p208_p11, %p202_p8 }
  0x1b   :  { %212 = shalt.err (!%p209_p12)
}
  0x1c   :  { %24 = dma.hbm_to_vmem [thread:$0]  %s344_s0, 128, %s22_s24, [#allocation4]  }
  0x1d   :  { %s51_s13 = sshll.u32 %s347_s3, 4  ;;  %s213_s14 = scalar_lea.vmem %s32_s27, 16  ;;  %s52_s13 = int_to_ptr.vmem [resolvable:$true] %s51_s13 }
  0x1e   :  { %p214_p13 = scmp.ne.s32.totalorder %s32_s27, %s213_s14  ;;  %p218_p0 = scmp.lt.s32.totalorder %s32_s27, %s32_s27 }
  0x1f   :  { %p219_p1 = scmp.lt.s32.totalorder %s213_s14, %s213_s14 }
  0x21   :  { %p220_p2 = por %p219_p1, %p218_p0 }
  0x23   :  { %p221_p3 = pnand %p220_p2, %p214_p13 }
  0x25   :  { %224 = shalt.err (!%p221_p3)
}
  0x26   :  { %s269_s15 = smov [#allocation7]   ;;  %s225_s16 = scalar_lea.vmem %s52_s13, 16 }
  0x27   :  { %34 = dma.vmem_to_smem %s32_s27, 16, %s269_s15, [#allocation6]  }
  0x28   :  { %p226_p4 = scmp.ne.s32.totalorder %s52_s13, %s225_s16  ;;  %p230_p5 = scmp.lt.s32.totalorder %s52_s13, %s52_s13 }
  0x29   :  { %p231_p6 = scmp.lt.s32.totalorder %s225_s16, %s225_s16 }
  0x2b   :  { %p232_p7 = por %p231_p6, %p230_p5 }
  0x2d   :  { %p233_p8 = pnand %p232_p7, %p226_p4 }
  0x2f   :  { %236 = shalt.err (!%p233_p8)
}
  0x30   :  { %s270_s0 = smov [#allocation10]  }
  0x31   :  { %54 = dma.vmem_to_smem %s52_s13, 16, %s270_s0, [#allocation9]  }
  0x32   :  { %259 = dma.done.wait [#allocation4], 128  }
  0x33   :  { %260 = vsyncadd [#allocation4], 4294967168 }
  0x34   :  { %261 = dma.done.wait [#allocation6], 16  }
  0x35   :  { %262 = vsyncadd [#allocation6], 4294967280 }
  0x36   :  { %263 = dma.done.wait [#allocation9], 32  }
  0x37   :  { %264 = vsyncadd [#allocation9], 4294967264 }
  0x38   :  { %69 = sfence }
  0x39   :  { %s75_s3 = sld [smem:[#allocation7]]  ;;  %s153_s17 = sld [smem:[#allocation7 + $0x4]]  ;;  %v70_v0 = vld [vmem:[#allocation3] sm:$0x1]  ;;  %v71_v1 = vld [vmem:[#allocation3 + $0x1] sm:$0x1]  ;;  %v73_v32 = vstv %s348_s4 }
  0x3a   :  { %s82_s18 = sld [smem:[#allocation8]]  ;;  %s154_s19 = sld [smem:[#allocation7 + $0x1]] }
  0x3b   :  { %s155_s20 = sld [smem:[#allocation7 + $0x5]]  ;;  %s323_s21 = sld [smem:[#allocation8 + $0x1]] }
  0x3c   :  { %s158_s22 = sld [smem:[#allocation7 + $0x2]]  ;;  %s159_s23 = sld [smem:[#allocation7 + $0x6]] }
  0x3d   :  { %s325_s24 = sld [smem:[#allocation8 + $0x2]]  ;;  %s162_s25 = sld [smem:[#allocation7 + $0x3]] }
  0x3e   :  { %s163_s26 = sld [smem:[#allocation7 + $0x7]]  ;;  %s164_s27 = sld [smem:[#allocation8 + $0x3]] }
  0x3f   :  { %v76_v2 = vstv %s75_s3  ;;  %v79_v4 = vstv %s153_s17  ;;  %s86_s2 = sld [smem:[#allocation10]]  ;;  %s157_s28 = sld [smem:[#allocation10 + $0x1]] }
  0x40   :  { %v77_v3 = vmul.f32 %v76_v2, %v70_v0  ;;  %v80_v5 = vmul.f32 %v79_v4, %v71_v1  ;;  %v91_v6 = vstv %s154_s19  ;;  %v83_v7 = vstv %s82_s18  ;;  %s161_s29 = sld [smem:[#allocation10 + $0x2]]  ;;  %s165_s30 = sld [smem:[#allocation10 + $0x3]] }
  0x41   :  { %v92_v8 = vmul.f32 %v91_v6, %v70_v0  ;;  %v94_v9 = vstv %s155_s20  ;;  %v98_v13 = vstv %s323_s21  ;;  %s271_s8 = smov [#allocation11]  }
  0x42   :  { %v81_v10 = vadd.f32 %v80_v5, %v77_v3  ;;  %v95_v11 = vmul.f32 %v94_v9, %v71_v1  ;;  %v106_v12 = vstv %s158_s22  ;;  %v109_v15 = vstv %s159_s23  ;;  %s142_s9 = sshll.u32 %s271_s8, 4  ;;  %s143_s9 = int_to_ptr.vmem [resolvable:$true] %s142_s9 }
  0x43   :  { %v107_v14 = vmul.f32 %v106_v12, %v70_v0  ;;  %v110_v18 = vmul.f32 %v109_v15, %v71_v1  ;;  %v113_v19 = vstv %s325_s24  ;;  %v121_v20 = vstv %s162_s25  ;;  %s237_s1 = scalar_lea.vmem %s143_s9, 16  ;;  %s241_s4 = scalar_lea.vmem %s143_s9, 32 }
  0x44   :  { %v84_v16 = vadd.f32 %v83_v7, %v81_v10  ;;  %v96_v17 = vadd.f32 %v95_v11, %v92_v8  ;;  %v124_v21 = vstv %s163_s26  ;;  %v122_v24 = vmul.f32 %v121_v20, %v70_v0  ;;  %p238_p9 = scmp.ne.s32.totalorder %s143_s9, %s237_s1  ;;  %p242_p10 = scmp.lt.s32.totalorder %s143_s9, %s143_s9 }
  0x45   :  { %v111_v23 = vadd.f32 %v110_v18, %v107_v14  ;;  %v125_v25 = vmul.f32 %v124_v21, %v71_v1  ;;  %v128_v27 = vstv %s164_s27  ;;  %v87_v30 = vstv %s86_s2  ;;  %p243_p11 = scmp.lt.s32.totalorder %s241_s4, %s237_s1 }
  0x46   :  { %171 = vtanh.f32 %v84_v16  ;;  %v99_v22 = vadd.f32 %v98_v13, %v96_v17  ;;  %v102_v33 = vstv %s157_s28  ;;  %v117_v36 = vstv %s161_s29 }
  0x47   :  { %v114_v26 = vadd.f32 %v113_v19, %v111_v23  ;;  %v126_v28 = vadd.f32 %v125_v25, %v122_v24  ;;  %v132_v42 = vstv %s165_s30  ;;  %p244_p12 = por %p243_p11, %p242_p10 }
  0x48   :  { %173 = vtanh.f32 %v99_v22 }
  0x49   :  { %175 = vtanh.f32 %v114_v26  ;;  %v129_v29 = vadd.f32 %v128_v27, %v126_v28  ;;  %p245_p13 = pnand %p244_p12, %p238_p9 }
  0x4b   :  { %177 = vtanh.f32 %v129_v29 }
  0x50   :  { %v172_v31 = vpop.eup %171 }
  0x51   :  { %v88_v34 = vmul.f32 %v172_v31, %v87_v30 }
  0x52   :  { %v174_v35 = vpop.eup %173 }
  0x53   :  { %v89_v37 = vadd.f32 %v88_v34, %v73_v32  ;;  %v103_v38 = vmul.f32 %v174_v35, %v102_v33  ;;  %v176_v39 = vpop.eup %175 }
  0x54   :  { %v118_v41 = vmul.f32 %v176_v39, %v117_v36 }
  0x55   :  { %v104_v40 = vadd.f32 %v103_v38, %v89_v37  ;;  %v178_v43 = vpop.eup %177 }
  0x56   :  { %v133_v45 = vmul.f32 %v178_v43, %v132_v42 }
  0x57   :  { %v119_v44 = vadd.f32 %v118_v41, %v104_v40 }
  0x59   :  { %v134_v46 = vadd.f32 %v133_v45, %v119_v44 }
  0x5b   :  { %135 = vst [vmem:[#allocation11] sm:$0x1] %v134_v46 }
  0x5c   :  { %248 = shalt.err (!%p245_p13)
}
  0x5d   :  { %s249_s12 = scalar_lea.hbm %s349_s5, 16 }
  0x5e   :  { %p250_p0 = scmp.ne.s32.totalorder %s349_s5, %s249_s12  ;;  %p253_p1 = scmp.lt.u32.totalorder %s249_s12, %s349_s5 }
  0x60   :  { %p255_p2 = pnand %p253_p1, %p250_p0 }
  0x62   :  { %258 = shalt.err (!%p255_p2)
}
  0x63   :  { %145 = dma.vmem_to_hbm [thread:$0]  %s143_s9, 16, %s349_s5, [#allocation5]  }
  0x64   :  { %265 = dma.done.wait [#allocation5], 16  }
  0x65   :  { %266 = vsyncadd [#allocation5], 4294967280 }
  0x66   :  { %149 = vsyncpa [#allocation4], 1 }
  0x67   :  { %150 = vsyncpa [#allocation5], 1 }
  0x68   :  { %151 = vsyncpa [#allocation6], 1 }
  0x69   :  { %152 = vsyncpa [#allocation9], 1 }

</bundles_post_ra>
